<compile_context>
chip_gen: v7x
topology: tpu7x:2x2x1
jax: 0.10.0
libtpu: 0.0.40
codegen_flags: <defaults>
</compile_context>

<pallas_src>
import functools

import jax
import jax.numpy as jnp
from jax.experimental import pallas as pl
from jax.experimental.pallas import tpu as pltpu

_LANE = 128   # lane width (last dim)
_ROW = 16     # row-tile multiple (covers bf16 sublane packing; f32 only needs 8)


def _round_up(n, m):
    return (n + m - 1) // m * m


def _relu(v):
    return jnp.maximum(v, 0.0)


def _tanh_sigmoid(z):
    # sigmoid(z) == 0.5*(tanh(z/2)+1): one EUP tanh push instead of exp + divide chain.
    return 0.5 * (jnp.tanh(0.5 * z) + 1.0)


def _default_act_dtype():
    """bf16 elementwise path on chips with bf16 VALU/EUP (v6e/v7x); f32 otherwise (v5e)."""
    try:
        kind = jax.devices()[0].device_kind.lower()
    except Exception:  # no device info -> safe default
        return jnp.float32
    if any(tag in kind for tag in ("v6", "v7", "7x")):
        return jnp.bfloat16
    return jnp.float32


def _vmem_cap_bytes():
    """Per-core VMEM capacity with headroom left for Mosaic internal scratch."""
    try:
        cap = int(pltpu.get_tpu_info().vmem_capacity_bytes)
    except Exception:  # introspection unavailable -> conservative value (fits v7x 64 MiB/TC)
        cap = 64 << 20
    return max(32 << 20, int(cap * 0.8))


# ----------------------------------------------------------------------------
# Kernel
# ----------------------------------------------------------------------------
def _mlp_kernel(act_dtype, x_ref, w_in, b_in, w_hid, b_hid, w_out, b_out, o_ref):
    """Whole 8-layer forward fused per batch tile.

    Matmuls are bf16 x bf16 with f32 accumulation on the MXU; bias adds and activations run
    in `act_dtype` (bf16 on v6e/v7x, f32 on v5e).
    """
    bf16 = jnp.bfloat16

    def lin(h, w, b):
        acc = jnp.dot(h.astype(bf16), w, preferred_element_type=jnp.float32)
        return acc.astype(act_dtype) + b

    h = jnp.tanh(lin(x_ref[...], w_in[...], b_in[...]))          # map1 + tanh
    hidden_acts = (jnp.tanh, jnp.tanh, _relu, _relu, _relu, _relu)
    for l, act in enumerate(hidden_acts):                         # statically unrolled
        h = act(lin(h, w_hid[l], b_hid[l]))                       # map2_1 .. map2_6_own
    z = lin(h, w_out[...], b_out[...])                            # map3_own
    o_ref[...] = _tanh_sigmoid(z).astype(o_ref.dtype)             # sigmoid


# ----------------------------------------------------------------------------
# Parameter init / packing
# ----------------------------------------------------------------------------
def init_params(key, input_size, hidden_size, output_size):
    """Synthetic nn.Linear-style init. Weights stored as [in, out] (i.e. W^T), f32."""
    dims = [(input_size, hidden_size)] + [(hidden_size, hidden_size)] * 6 \
        + [(hidden_size, output_size)]
    params = []
    for d_in, d_out in dims:
        key, kw, kb = jax.random.split(key, 3)
        bound = 1.0 / jnp.sqrt(jnp.float32(d_in))
        w = jax.random.uniform(kw, (d_in, d_out), jnp.float32, -bound, bound)
        b = jax.random.uniform(kb, (1, d_out), jnp.float32, -bound, bound)
        params.append((w, b))
    return params


def prepare_params(params, *, act_dtype=None):
    """Pad feature dims to multiples of 128, cast weights to bf16 (MXU inputs) and biases to
    the elementwise dtype, and pack the 6 hidden layers into single [6,H,H] / [6,1,H] arrays.

    Zero padding is exact: padded activation lanes are tanh(0)/relu(0) = 0 and padded weight
    rows/cols are 0, so they contribute nothing to later layers.
    """
    if act_dtype is None:
        act_dtype = _default_act_dtype()
    bf16 = jnp.bfloat16
    w0, b0 = params[0]
    w_last, b_last = params[-1]
    d_in, d_h = w0.shape
    d_out = w_last.shape[1]
    in_p = _round_up(d_in, _LANE)
    h_p = _round_up(d_h, _LANE)
    out_p = _round_up(d_out, _LANE)

    w_in = jnp.zeros((in_p, h_p), bf16).at[:d_in, :d_h].set(w0.astype(bf16))
    b_in = jnp.zeros((1, h_p), act_dtype).at[:, :d_h].set(b0.astype(act_dtype))
    w_hid = jnp.zeros((6, h_p, h_p), bf16)
    b_hid = jnp.zeros((6, 1, h_p), act_dtype)
    for l, (w, b) in enumerate(params[1:7]):
        w_hid = w_hid.at[l, :d_h, :d_h].set(w.astype(bf16))
        b_hid = b_hid.at[l, :, :d_h].set(b.astype(act_dtype))
    w_out = jnp.zeros((h_p, out_p), bf16).at[:d_h, :d_out].set(w_last.astype(bf16))
    b_out = jnp.zeros((1, out_p), act_dtype).at[:, :d_out].set(b_last.astype(act_dtype))
    return dict(w_in=w_in, b_in=b_in, w_hid=w_hid, b_hid=b_hid,
                w_out=w_out, b_out=b_out, act_dtype=act_dtype,
                dims=(d_in, d_h, d_out))


# ----------------------------------------------------------------------------
# Wrapper
# ----------------------------------------------------------------------------
def discriminator_forward(x, prepared, output_size, *, batch_tile=None,
                          out_dtype=jnp.bfloat16):
    """x: [B, input_size]. Returns [B, output_size] in `out_dtype`."""
    act_dtype = prepared["act_dtype"]
    w_in, b_in = prepared["w_in"], prepared["b_in"]
    w_hid, b_hid = prepared["w_hid"], prepared["b_hid"]
    w_out, b_out = prepared["w_out"], prepared["b_out"]
    in_p, h_p = w_in.shape
    out_p = w_out.shape[1]

    B, d_in = x.shape
    param_arrays = (w_in, b_in, w_hid, b_hid, w_out, b_out)
    param_bytes = sum(int(a.size) * a.dtype.itemsize for a in param_arrays)
    act_itemsize = jnp.dtype(act_dtype).itemsize
    out_itemsize = jnp.dtype(out_dtype).itemsize

    # ---- batch tile selection ------------------------------------------------
    if batch_tile is None:
        # Large tiles amortize the ~0.35us fixed per-grid-step overhead.
        batch_tile = min(2048, _round_up(B, _ROW))
        # Keep >=2 grid steps when the batch is big enough, so the "parallel" axis can
        # shard over both TensorCores on v7x (one extra step is noise on 1-TC chips).
        if B >= 256 and _round_up(B, _ROW) <= batch_tile:
            batch_tile = _round_up(pl.cdiv(B, 2), _ROW)
    batch_tile = max(_ROW, _round_up(int(batch_tile), _ROW))

    vmem_cap = _vmem_cap_bytes()

    def vmem_est(param_copies, bt):
        return (param_copies * param_bytes
                + 2 * bt * in_p * 2                 # x tile (bf16), double-buffered
                + 2 * bt * out_p * out_itemsize     # out tile, double-buffered
                + 4 * bt * h_p * act_itemsize)      # live activation headroom

    while vmem_est(1, batch_tile) > vmem_cap and batch_tile > _ROW:
        batch_tile = max(_ROW, _round_up(batch_tile // 2, _ROW))
    if vmem_est(1, batch_tile) > vmem_cap:
        # TODO(synk): stream weights layer-by-layer from HBM (pl.ANY + pltpu.emit_pipeline)
        # when resident params exceed VMEM (very large hidden_size, esp. v7x's 64 MiB/TC).
        raise ValueError(
            "Discriminator weights do not fit in VMEM for the resident-weights kernel.")

    B_pad = _round_up(B, batch_tile)
    grid = (B_pad // batch_tile,)

    # Pad x once, in bf16 (the kernel feeds bf16 to the first MXU matmul anyway).
    x_pad = jnp.zeros((B_pad, in_p), jnp.bfloat16).at[:B, :d_in].set(
        x.astype(jnp.bfloat16))

    # ---- cost estimate ---------------------------------------------------------
    flops = 2 * B_pad * (in_p * h_p + 6 * h_p * h_p + h_p * out_p)
    transcendentals = B_pad * (3 * h_p + out_p)            # 3x tanh + tanh-based sigmoid
    bytes_accessed = param_bytes + int(x_pad.size) * 2 + B_pad * out_p * out_itemsize
    cost = pl.CostEstimate(flops=flops, transcendentals=transcendentals,
                           bytes_accessed=bytes_accessed)

    kernel = functools.partial(_mlp_kernel, act_dtype)

    def build(single_buffer_params):
        def const_spec(arr):
            nd = arr.ndim
            idx = lambda i, _nd=nd: (0,) * _nd
            if single_buffer_params:
                # Constant index_map -> one resident copy; double buffering is pure VMEM waste.
                return pl.BlockSpec(arr.shape, idx,
                                    pipeline_mode=pl.Buffered(buffer_count=1))
            return pl.BlockSpec(arr.shape, idx)

        grid_spec = pltpu.PrefetchScalarGridSpec(
            num_scalar_prefetch=0,
            grid=grid,
            in_specs=[pl.BlockSpec((batch_tile, in_p), lambda i: (i, 0))]
                     + [const_spec(a) for a in param_arrays],
            out_specs=pl.BlockSpec((batch_tile, out_p), lambda i: (i, 0)),
        )
        copies = 1 if single_buffer_params else 2
        vmem_limit = int(min(vmem_cap,
                             max(vmem_est(copies, batch_tile) + (8 << 20), 32 << 20)))
        return pl.pallas_call(
            kernel,
            out_shape=jax.ShapeDtypeStruct((B_pad, out_p), out_dtype),
            grid_spec=grid_spec,
            compiler_params=pltpu.CompilerParams(
                dimension_semantics=("parallel",),
                vmem_limit_bytes=vmem_limit),
            cost_estimate=cost,
        )

    try:
        out = build(single_buffer_params=True)(x_pad, *param_arrays)
    except (TypeError, NotImplementedError, pltpu.LoweringException):
        # Narrow fallback: only if pipeline_mode=pl.Buffered(1) is unsupported on this build.
        out = build(single_buffer_params=False)(x_pad, *param_arrays)

    return out[:B, :output_size]


# ----------------------------------------------------------------------------
# References
# ----------------------------------------------------------------------------
def reference_forward(x, params):
    """Pure f32 reference matching the PyTorch module exactly."""
    acts = [jnp.tanh] * 3 + [jax.nn.relu] * 4
    h = x.astype(jnp.float32)
    for (w, b), act in zip(params[:-1], acts):
        h = act(jnp.dot(h, w) + b)
    w, b = params[-1]
    return jax.nn.sigmoid(jnp.dot(h, w) + b)


def reference_forward_kernel_precision(x, params, act_dtype, out_dtype):
    """Pure-JAX reference emulating the kernel's precision path (bf16 MXU inputs with f32
    accumulation, `act_dtype` bias/activations, tanh-based sigmoid, `out_dtype` output)."""
    bf16 = jnp.bfloat16

    def lin(h, w, b):
        acc = jnp.dot(h.astype(bf16), w.astype(bf16),
                      preferred_element_type=jnp.float32)
        return acc.astype(act_dtype) + b.astype(act_dtype)

    acts = [jnp.tanh] * 3 + [_relu] * 4
    h = x.astype(bf16)
    for (w, b), act in zip(params[:-1], acts):
        h = act(lin(h, w, b))
    w, b = params[-1]
    return _tanh_sigmoid(lin(h, w, b)).astype(out_dtype)


# ----------------------------------------------------------------------------
# Main
# ----------------------------------------------------------------------------
if __name__ == "__main__":
    key = jax.random.PRNGKey(0)
    batch, input_size, hidden_size, output_size = 8, 16, 32, 4

    key, kx, kx2 = jax.random.split(key, 3)
    x = jax.random.normal(kx, (batch, input_size), jnp.float32)
    params = init_params(key, input_size, hidden_size, output_size)

    act_dtype = _default_act_dtype()
    out_dtype = jnp.bfloat16
    prepared = prepare_params(params, act_dtype=act_dtype)

    # Single-tile case (grid=(1,)).
    out = discriminator_forward(x, prepared, output_size, out_dtype=out_dtype)
    out = jax.block_until_ready(out)
    assert out.shape == (batch, output_size)
    ref_match = reference_forward_kernel_precision(x, params, act_dtype, out_dtype)
    assert jnp.allclose(out.astype(jnp.float32), ref_match.astype(jnp.float32),
                        atol=1e-2, rtol=1e-2)
    ref_f32 = reference_forward(x, params)
    assert jnp.allclose(out.astype(jnp.float32), ref_f32, atol=8e-2, rtol=8e-2)

    # Multi-tile case: batch not a multiple of the tile -> exercises row padding + grid=(4,).
    x2 = jax.random.normal(kx2, (200, input_size), jnp.float32)
    out2 = discriminator_forward(x2, prepared, output_size, batch_tile=64,
                                 out_dtype=out_dtype)
    out2 = jax.block_until_ready(out2)
    assert out2.shape == (200, output_size)
    ref2 = reference_forward_kernel_precision(x2, params, act_dtype, out_dtype)
    assert jnp.allclose(out2.astype(jnp.float32), ref2.astype(jnp.float32),
                        atol=1e-2, rtol=1e-2)

    print("KERNEL_OK")
</pallas_src>

<mosaic_0001>
module attributes {stable_mosaic.version = 11 : i64} {
  func.func @_mlp_kernel(%arg0: i32, %arg1: memref<16x128xbf16, #tpu.memory_space<vmem>>, %arg2: memref<128x128xbf16, #tpu.memory_space<vmem>>, %arg3: memref<1x128xf32, #tpu.memory_space<vmem>>, %arg4: memref<6x128x128xbf16, #tpu.memory_space<vmem>>, %arg5: memref<6x1x128xf32, #tpu.memory_space<vmem>>, %arg6: memref<128x128xbf16, #tpu.memory_space<vmem>>, %arg7: memref<1x128xf32, #tpu.memory_space<vmem>>, %arg8: memref<16x128xbf16, #tpu.memory_space<vmem>>) attributes {dimension_semantics = [#tpu.dimension_semantics<parallel>], iteration_bounds = array<i64: 1>, scalar_prefetch = 0 : i64, scratch_operands = 0 : i64, tpu.core_type = #tpu.core_type<tc>, window_params = [{transform_indices = @transform_0, window_bounds = array<i64: 16, 128>}, {pipeline_mode = #tpu.pipeline_mode<synchronous>, transform_indices = @transform_1, window_bounds = array<i64: 128, 128>}, {pipeline_mode = #tpu.pipeline_mode<synchronous>, transform_indices = @transform_2, window_bounds = array<i64: 1, 128>}, {pipeline_mode = #tpu.pipeline_mode<synchronous>, transform_indices = @transform_3, window_bounds = array<i64: 6, 128, 128>}, {pipeline_mode = #tpu.pipeline_mode<synchronous>, transform_indices = @transform_4, window_bounds = array<i64: 6, 1, 128>}, {pipeline_mode = #tpu.pipeline_mode<synchronous>, transform_indices = @transform_5, window_bounds = array<i64: 128, 128>}, {pipeline_mode = #tpu.pipeline_mode<synchronous>, transform_indices = @transform_6, window_bounds = array<i64: 1, 128>}, {transform_indices = @transform_7, window_bounds = array<i64: 16, 128>}]} {
    %c0 = arith.constant 0 : index
    %c0_0 = arith.constant 0 : index
    %0 = vector.load %arg1[%c0, %c0_0] : memref<16x128xbf16, #tpu.memory_space<vmem>>, vector<16x128xbf16>
    %c0_1 = arith.constant 0 : index
    %c0_2 = arith.constant 0 : index
    %1 = vector.load %arg2[%c0_1, %c0_2] : memref<128x128xbf16, #tpu.memory_space<vmem>>, vector<128x128xbf16>
    %c0_3 = arith.constant 0 : index
    %c0_4 = arith.constant 0 : index
    %2 = vector.load %arg3[%c0_3, %c0_4] : memref<1x128xf32, #tpu.memory_space<vmem>>, vector<1x128xf32>
    %cst = arith.constant dense<0.000000e+00> : vector<16x128xf32>
    %3 = tpu.matmul %0, %1, %cst {dimension_numbers = #tpu.dot_dimension_numbers<[1], [0], [0], [1], [0, 0, 1, 1], [], []>} : vector<16x128xbf16>, vector<128x128xbf16>, vector<16x128xf32> -> vector<16x128xf32>
    %4 = vector.broadcast %2 : vector<1x128xf32> to vector<16x128xf32>
    %5 = arith.addf %3, %4 : vector<16x128xf32>
    %6 = math.tanh %5 : vector<16x128xf32>
    %c0_5 = arith.constant 0 : index
    %c0_6 = arith.constant 0 : index
    %c0_7 = arith.constant 0 : index
    %7 = vector.load %arg4[%c0_5, %c0_6, %c0_7] : memref<6x128x128xbf16, #tpu.memory_space<vmem>>, vector<1x128x128xbf16>
    %8 = vector.shape_cast %7 : vector<1x128x128xbf16> to vector<128x128xbf16>
    %c0_8 = arith.constant 0 : index
    %c0_9 = arith.constant 0 : index
    %c0_10 = arith.constant 0 : index
    %9 = vector.load %arg5[%c0_8, %c0_9, %c0_10] : memref<6x1x128xf32, #tpu.memory_space<vmem>>, vector<1x1x128xf32>
    %10 = vector.shape_cast %9 : vector<1x1x128xf32> to vector<1x128xf32>
    %11 = arith.truncf %6 : vector<16x128xf32> to vector<16x128xbf16>
    %cst_11 = arith.constant dense<0.000000e+00> : vector<16x128xf32>
    %12 = tpu.matmul %11, %8, %cst_11 {dimension_numbers = #tpu.dot_dimension_numbers<[1], [0], [0], [1], [0, 0, 1, 1], [], []>} : vector<16x128xbf16>, vector<128x128xbf16>, vector<16x128xf32> -> vector<16x128xf32>
    %13 = vector.broadcast %10 : vector<1x128xf32> to vector<16x128xf32>
    %14 = arith.addf %12, %13 : vector<16x128xf32>
    %15 = math.tanh %14 : vector<16x128xf32>
    %c1 = arith.constant 1 : index
    %c0_12 = arith.constant 0 : index
    %c0_13 = arith.constant 0 : index
    %16 = vector.load %arg4[%c1, %c0_12, %c0_13] : memref<6x128x128xbf16, #tpu.memory_space<vmem>>, vector<1x128x128xbf16>
    %17 = vector.shape_cast %16 : vector<1x128x128xbf16> to vector<128x128xbf16>
    %c1_14 = arith.constant 1 : index
    %c0_15 = arith.constant 0 : index
    %c0_16 = arith.constant 0 : index
    %18 = vector.load %arg5[%c1_14, %c0_15, %c0_16] : memref<6x1x128xf32, #tpu.memory_space<vmem>>, vector<1x1x128xf32>
    %19 = vector.shape_cast %18 : vector<1x1x128xf32> to vector<1x128xf32>
    %20 = arith.truncf %15 : vector<16x128xf32> to vector<16x128xbf16>
    %cst_17 = arith.constant dense<0.000000e+00> : vector<16x128xf32>
    %21 = tpu.matmul %20, %17, %cst_17 {dimension_numbers = #tpu.dot_dimension_numbers<[1], [0], [0], [1], [0, 0, 1, 1], [], []>} : vector<16x128xbf16>, vector<128x128xbf16>, vector<16x128xf32> -> vector<16x128xf32>
    %22 = vector.broadcast %19 : vector<1x128xf32> to vector<16x128xf32>
    %23 = arith.addf %21, %22 : vector<16x128xf32>
    %24 = math.tanh %23 : vector<16x128xf32>
    %c2 = arith.constant 2 : index
    %c0_18 = arith.constant 0 : index
    %c0_19 = arith.constant 0 : index
    %25 = vector.load %arg4[%c2, %c0_18, %c0_19] : memref<6x128x128xbf16, #tpu.memory_space<vmem>>, vector<1x128x128xbf16>
    %26 = vector.shape_cast %25 : vector<1x128x128xbf16> to vector<128x128xbf16>
    %c2_20 = arith.constant 2 : index
    %c0_21 = arith.constant 0 : index
    %c0_22 = arith.constant 0 : index
    %27 = vector.load %arg5[%c2_20, %c0_21, %c0_22] : memref<6x1x128xf32, #tpu.memory_space<vmem>>, vector<1x1x128xf32>
    %28 = vector.shape_cast %27 : vector<1x1x128xf32> to vector<1x128xf32>
    %29 = arith.truncf %24 : vector<16x128xf32> to vector<16x128xbf16>
    %cst_23 = arith.constant dense<0.000000e+00> : vector<16x128xf32>
    %30 = tpu.matmul %29, %26, %cst_23 {dimension_numbers = #tpu.dot_dimension_numbers<[1], [0], [0], [1], [0, 0, 1, 1], [], []>} : vector<16x128xbf16>, vector<128x128xbf16>, vector<16x128xf32> -> vector<16x128xf32>
    %31 = vector.broadcast %28 : vector<1x128xf32> to vector<16x128xf32>
    %32 = arith.addf %30, %31 : vector<16x128xf32>
    %cst_24 = arith.constant 0.000000e+00 : f32
    %33 = vector.broadcast %cst_24 : f32 to vector<16x128xf32>
    %34 = arith.maximumf %32, %33 : vector<16x128xf32>
    %c3 = arith.constant 3 : index
    %c0_25 = arith.constant 0 : index
    %c0_26 = arith.constant 0 : index
    %35 = vector.load %arg4[%c3, %c0_25, %c0_26] : memref<6x128x128xbf16, #tpu.memory_space<vmem>>, vector<1x128x128xbf16>
    %36 = vector.shape_cast %35 : vector<1x128x128xbf16> to vector<128x128xbf16>
    %c3_27 = arith.constant 3 : index
    %c0_28 = arith.constant 0 : index
    %c0_29 = arith.constant 0 : index
    %37 = vector.load %arg5[%c3_27, %c0_28, %c0_29] : memref<6x1x128xf32, #tpu.memory_space<vmem>>, vector<1x1x128xf32>
    %38 = vector.shape_cast %37 : vector<1x1x128xf32> to vector<1x128xf32>
    %39 = arith.truncf %34 : vector<16x128xf32> to vector<16x128xbf16>
    %cst_30 = arith.constant dense<0.000000e+00> : vector<16x128xf32>
    %40 = tpu.matmul %39, %36, %cst_30 {dimension_numbers = #tpu.dot_dimension_numbers<[1], [0], [0], [1], [0, 0, 1, 1], [], []>} : vector<16x128xbf16>, vector<128x128xbf16>, vector<16x128xf32> -> vector<16x128xf32>
    %41 = vector.broadcast %38 : vector<1x128xf32> to vector<16x128xf32>
    %42 = arith.addf %40, %41 : vector<16x128xf32>
    %cst_31 = arith.constant 0.000000e+00 : f32
    %43 = vector.broadcast %cst_31 : f32 to vector<16x128xf32>
    %44 = arith.maximumf %42, %43 : vector<16x128xf32>
    %c4 = arith.constant 4 : index
    %c0_32 = arith.constant 0 : index
    %c0_33 = arith.constant 0 : index
    %45 = vector.load %arg4[%c4, %c0_32, %c0_33] : memref<6x128x128xbf16, #tpu.memory_space<vmem>>, vector<1x128x128xbf16>
    %46 = vector.shape_cast %45 : vector<1x128x128xbf16> to vector<128x128xbf16>
    %c4_34 = arith.constant 4 : index
    %c0_35 = arith.constant 0 : index
    %c0_36 = arith.constant 0 : index
    %47 = vector.load %arg5[%c4_34, %c0_35, %c0_36] : memref<6x1x128xf32, #tpu.memory_space<vmem>>, vector<1x1x128xf32>
    %48 = vector.shape_cast %47 : vector<1x1x128xf32> to vector<1x128xf32>
    %49 = arith.truncf %44 : vector<16x128xf32> to vector<16x128xbf16>
    %cst_37 = arith.constant dense<0.000000e+00> : vector<16x128xf32>
    %50 = tpu.matmul %49, %46, %cst_37 {dimension_numbers = #tpu.dot_dimension_numbers<[1], [0], [0], [1], [0, 0, 1, 1], [], []>} : vector<16x128xbf16>, vector<128x128xbf16>, vector<16x128xf32> -> vector<16x128xf32>
    %51 = vector.broadcast %48 : vector<1x128xf32> to vector<16x128xf32>
    %52 = arith.addf %50, %51 : vector<16x128xf32>
    %cst_38 = arith.constant 0.000000e+00 : f32
    %53 = vector.broadcast %cst_38 : f32 to vector<16x128xf32>
    %54 = arith.maximumf %52, %53 : vector<16x128xf32>
    %c5 = arith.constant 5 : index
    %c0_39 = arith.constant 0 : index
    %c0_40 = arith.constant 0 : index
    %55 = vector.load %arg4[%c5, %c0_39, %c0_40] : memref<6x128x128xbf16, #tpu.memory_space<vmem>>, vector<1x128x128xbf16>
    %56 = vector.shape_cast %55 : vector<1x128x128xbf16> to vector<128x128xbf16>
    %c5_41 = arith.constant 5 : index
    %c0_42 = arith.constant 0 : index
    %c0_43 = arith.constant 0 : index
    %57 = vector.load %arg5[%c5_41, %c0_42, %c0_43] : memref<6x1x128xf32, #tpu.memory_space<vmem>>, vector<1x1x128xf32>
    %58 = vector.shape_cast %57 : vector<1x1x128xf32> to vector<1x128xf32>
    %59 = arith.truncf %54 : vector<16x128xf32> to vector<16x128xbf16>
    %cst_44 = arith.constant dense<0.000000e+00> : vector<16x128xf32>
    %60 = tpu.matmul %59, %56, %cst_44 {dimension_numbers = #tpu.dot_dimension_numbers<[1], [0], [0], [1], [0, 0, 1, 1], [], []>} : vector<16x128xbf16>, vector<128x128xbf16>, vector<16x128xf32> -> vector<16x128xf32>
    %61 = vector.broadcast %58 : vector<1x128xf32> to vector<16x128xf32>
    %62 = arith.addf %60, %61 : vector<16x128xf32>
    %cst_45 = arith.constant 0.000000e+00 : f32
    %63 = vector.broadcast %cst_45 : f32 to vector<16x128xf32>
    %64 = arith.maximumf %62, %63 : vector<16x128xf32>
    %c0_46 = arith.constant 0 : index
    %c0_47 = arith.constant 0 : index
    %65 = vector.load %arg6[%c0_46, %c0_47] : memref<128x128xbf16, #tpu.memory_space<vmem>>, vector<128x128xbf16>
    %c0_48 = arith.constant 0 : index
    %c0_49 = arith.constant 0 : index
    %66 = vector.load %arg7[%c0_48, %c0_49] : memref<1x128xf32, #tpu.memory_space<vmem>>, vector<1x128xf32>
    %67 = arith.truncf %64 : vector<16x128xf32> to vector<16x128xbf16>
    %cst_50 = arith.constant dense<0.000000e+00> : vector<16x128xf32>
    %68 = tpu.matmul %67, %65, %cst_50 {dimension_numbers = #tpu.dot_dimension_numbers<[1], [0], [0], [1], [0, 0, 1, 1], [], []>} : vector<16x128xbf16>, vector<128x128xbf16>, vector<16x128xf32> -> vector<16x128xf32>
    %69 = vector.broadcast %66 : vector<1x128xf32> to vector<16x128xf32>
    %70 = arith.addf %68, %69 : vector<16x128xf32>
    %cst_51 = arith.constant 5.000000e-01 : f32
    %71 = vector.broadcast %cst_51 : f32 to vector<16x128xf32>
    %72 = arith.mulf %71, %70 : vector<16x128xf32>
    %73 = math.tanh %72 : vector<16x128xf32>
    %cst_52 = arith.constant 1.000000e+00 : f32
    %74 = vector.broadcast %cst_52 : f32 to vector<16x128xf32>
    %75 = arith.addf %73, %74 : vector<16x128xf32>
    %cst_53 = arith.constant 5.000000e-01 : f32
    %76 = vector.broadcast %cst_53 : f32 to vector<16x128xf32>
    %77 = arith.mulf %76, %75 : vector<16x128xf32>
    %78 = arith.truncf %77 : vector<16x128xf32> to vector<16x128xbf16>
    %c0_54 = arith.constant 0 : index
    %c0_55 = arith.constant 0 : index
    %79 = vector.load %arg8[%c0_54, %c0_55] : memref<16x128xbf16, #tpu.memory_space<vmem>>, vector<16x128xbf16>
    tpu.vector_store %arg8[%c0_54, %c0_55], %78 {strides = array<i32>} : memref<16x128xbf16, #tpu.memory_space<vmem>>, vector<16x128xbf16>,
    return
  }
  func.func @transform_0(%arg0: i32) -> (i32, i32) {
    %c0_i32 = arith.constant 0 : i32
    %c0_i32_0 = arith.constant 0 : i32
    return %arg0, %c0_i32 : i32, i32
  }
  func.func @transform_1(%arg0: i32) -> (i32, i32) {
    %c0_i32 = arith.constant 0 : i32
    %c0_i32_0 = arith.constant 0 : i32
    %c0_i32_1 = arith.constant 0 : i32
    return %c0_i32, %c0_i32_0 : i32, i32
  }
  func.func @transform_2(%arg0: i32) -> (i32, i32) {
    %c0_i32 = arith.constant 0 : i32
    %c0_i32_0 = arith.constant 0 : i32
    %c0_i32_1 = arith.constant 0 : i32
    return %c0_i32, %c0_i32_0 : i32, i32
  }
  func.func @transform_3(%arg0: i32) -> (i32, i32, i32) {
    %c0_i32 = arith.constant 0 : i32
    %c0_i32_0 = arith.constant 0 : i32
    %c0_i32_1 = arith.constant 0 : i32
    %c0_i32_2 = arith.constant 0 : i32
    return %c0_i32, %c0_i32_0, %c0_i32_1 : i32, i32, i32
  }
  func.func @transform_4(%arg0: i32) -> (i32, i32, i32) {
    %c0_i32 = arith.constant 0 : i32
    %c0_i32_0 = arith.constant 0 : i32
    %c0_i32_1 = arith.constant 0 : i32
    %c0_i32_2 = arith.constant 0 : i32
    return %c0_i32, %c0_i32_0, %c0_i32_1 : i32, i32, i32
  }
  func.func @transform_5(%arg0: i32) -> (i32, i32) {
    %c0_i32 = arith.constant 0 : i32
    %c0_i32_0 = arith.constant 0 : i32
    %c0_i32_1 = arith.constant 0 : i32
    return %c0_i32, %c0_i32_0 : i32, i32
  }
  func.func @transform_6(%arg0: i32) -> (i32, i32) {
    %c0_i32 = arith.constant 0 : i32
    %c0_i32_0 = arith.constant 0 : i32
    %c0_i32_1 = arith.constant 0 : i32
    return %c0_i32, %c0_i32_0 : i32, i32
  }
  func.func @transform_7(%arg0: i32) -> (i32, i32) {
    %c0_i32 = arith.constant 0 : i32
    %c0_i32_0 = arith.constant 0 : i32
    return %arg0, %c0_i32 : i32, i32
  }
}

</mosaic_0001>

<bundles_post_ra>
// kernel: tpu_custom_call.1
= control target key start
LH: loop header
LB: loop body
LE: loop exit
PB: predicated region body
PF: predicated region fallthrough
CT: control target
= control target key end

     0   :  { %12 = vsyncpa [#allocation3], 0  ;;  %s1824_s0 = inlined_call_operand.hbm [shape: bf16[16,128], index: 0, kind: input, shape index: {}]   ;;  %s1825_s1 = inlined_call_operand.hbm [shape: bf16[128,128], index: 1, kind: input, shape index: {}]   ;;  %s1826_s2 = inlined_call_operand.vmem [shape: f32[1,128], index: 2, kind: input, shape index: {}]   ;;  %s1827_s3 = inlined_call_operand.hbm [shape: bf16[6,128,128], index: 3, kind: input, shape index: {}]   ;;  %s1828_s4 = inlined_call_operand.vmem [shape: f32[6,1,128], index: 4, kind: input, shape index: {}]   ;;  %s1829_s5 = inlined_call_operand.hbm [shape: bf16[128,128], index: 5, kind: input, shape index: {}]   ;;  %s1830_s6 = inlined_call_operand.vmem [shape: f32[1,128], index: 6, kind: input, shape index: {}]   ;;  %s1831_s7 = inlined_call_operand.hbm [shape: bf16[16,128], index: 7, kind: output, shape index: {}]  }
   0x1   :  { %13 = vsyncpa [#allocation6], 0 }
   0x2   :  { %14 = vsyncpa [#allocation9], 0 }
   0x3   :  { %15 = vsyncpa [#allocation4], 0  ;;  %s1582_s24 = smov [#allocation5]   ;;  %s1583_s26 = smov [#allocation2]  }
   0x4   :  { %s33_s25 = sshll.u32 %s1582_s24, 4  ;;  %s21_s27 = sshll.u32 %s1583_s26, 4  ;;  %s34_s25 = int_to_ptr.vmem [resolvable:$true] %s33_s25  ;;  %s1631_s27 = int_to_ptr.vmem [resolvable:$true] %s21_s27 }
   0x5   :  { %s1464_s30 = scalar_lea.hbm %s1825_s1, 1024 }
   0x6   :  { %p1465_p0 = scmp.ne.s32.totalorder %s1825_s1, %s1464_s30  ;;  %p1468_p1 = scmp.lt.u32.totalorder %s1464_s30, %s1825_s1 }
   0x8   :  { %p1470_p2 = pnand %p1468_p1, %p1465_p0 }
   0xa   :  { %1473 = shalt.err (!%p1470_p2)
}
   0xb   :  { %s1474_s12 = scalar_lea.vmem %s34_s25, 1024  ;;  %p1479_p4 = scmp.lt.s32.totalorder %s34_s25, %s34_s25 }
   0xc   :  { %p1475_p3 = scmp.ne.s32.totalorder %s34_s25, %s1474_s12  ;;  %p1480_p5 = scmp.lt.s32.totalorder %s1474_s12, %s1474_s12 }
   0xe   :  { %p1481_p6 = por %p1480_p5, %p1479_p4 }
  0x10   :  { %p1482_p7 = pnand %p1481_p6, %p1475_p3 }
  0x12   :  { %1485 = shalt.err (!%p1482_p7)
}
  0x13   :  { %s1584_s13 = smov 64   ;;  %s1585_s14 = smov 4  }
  0x14   :  { %39 = dma.hbm_to_vmem [thread:$0]  %s1825_s1, 1024, %s34_s25, [#allocation6], %s1584_s13, %s1584_s13, %s1585_s14  }
  0x15   :  { %s1486_s19 = scalar_lea.hbm %s1824_s0, 128 }
  0x16   :  { %p1487_p8 = scmp.ne.s32.totalorder %s1824_s0, %s1486_s19  ;;  %p1490_p9 = scmp.lt.u32.totalorder %s1486_s19, %s1824_s0 }
  0x18   :  { %p1492_p10 = pnand %p1490_p9, %p1487_p8 }
  0x1a   :  { %1495 = shalt.err (!%p1492_p10)
}
  0x1b   :  { %s1496_s24 = scalar_lea.vmem %s1631_s27, 128  ;;  %p1501_p12 = scmp.lt.s32.totalorder %s1631_s27, %s1631_s27 }
  0x1c   :  { %p1497_p11 = scmp.ne.s32.totalorder %s1631_s27, %s1496_s24  ;;  %p1502_p13 = scmp.lt.s32.totalorder %s1496_s24, %s1496_s24 }
  0x1e   :  { %p1503_p0 = por %p1502_p13, %p1501_p12 }
  0x20   :  { %p1504_p1 = pnand %p1503_p0, %p1497_p11 }
  0x22   :  { %1507 = shalt.err (!%p1504_p1)
}
  0x23   :  { %27 = dma.hbm_to_vmem [thread:$0]  %s1824_s0, 128, %s1631_s27, [#allocation3], %s1584_s13, %s1584_s13, %s1585_s14  }
  0x24   :  { %s1586_s26 = smov [#allocation7]   ;;  %s1587_s29 = smov [#allocation8]  }
  0x25   :  { %s47_s28 = sshll.u32 %s1586_s26, 4  ;;  %s61_s30 = sshll.u32 %s1587_s29, 4  ;;  %s48_s28 = int_to_ptr.vmem [resolvable:$true] %s47_s28  ;;  %s1668_s30 = int_to_ptr.vmem [resolvable:$true] %s61_s30 }
  0x26   :  { %s1508_s10 = scalar_lea.hbm %s1827_s3, 6144 }
  0x27   :  { %p1509_p2 = scmp.ne.s32.totalorder %s1827_s3, %s1508_s10  ;;  %p1512_p3 = scmp.lt.u32.totalorder %s1508_s10, %s1827_s3 }
  0x29   :  { %p1514_p4 = pnand %p1512_p3, %p1509_p2 }
  0x2b   :  { %1517 = shalt.err (!%p1514_p4)
}
  0x2c   :  { %s1518_s0 = scalar_lea.vmem %s48_s28, 6144  ;;  %p1523_p6 = scmp.lt.s32.totalorder %s48_s28, %s48_s28 }
  0x2d   :  { %p1519_p5 = scmp.ne.s32.totalorder %s48_s28, %s1518_s0  ;;  %p1524_p7 = scmp.lt.s32.totalorder %s1518_s0, %s1518_s0 }
  0x2f   :  { %p1525_p8 = por %p1524_p7, %p1523_p6 }
  0x31   :  { %p1526_p9 = pnand %p1525_p8, %p1519_p5 }
  0x33   :  { %1529 = shalt.err (!%p1526_p9)
}
  0x34   :  { %53 = dma.hbm_to_vmem [thread:$0]  %s1827_s3, 6144, %s48_s28, [#allocation6], %s1584_s13, %s1584_s13, %s1585_s14  }
  0x35   :  { %s1530_s20 = scalar_lea.hbm %s1829_s5, 1024 }
  0x36   :  { %p1531_p10 = scmp.ne.s32.totalorder %s1829_s5, %s1530_s20  ;;  %p1534_p11 = scmp.lt.u32.totalorder %s1530_s20, %s1829_s5 }
  0x38   :  { %p1536_p12 = pnand %p1534_p11, %p1531_p10 }
  0x3a   :  { %1539 = shalt.err (!%p1536_p12)
}
  0x3b   :  { %s1540_s1 = scalar_lea.vmem %s1668_s30, 1024  ;;  %p1545_p0 = scmp.lt.s32.totalorder %s1668_s30, %s1668_s30 }
  0x3c   :  { %p1541_p13 = scmp.ne.s32.totalorder %s1668_s30, %s1540_s1  ;;  %p1546_p1 = scmp.lt.s32.totalorder %s1540_s1, %s1540_s1 }
  0x3e   :  { %p1547_p2 = por %p1546_p1, %p1545_p0 }
  0x40   :  { %p1548_p3 = pnand %p1547_p2, %p1541_p13 }
  0x42   :  { %1551 = shalt.err (!%p1548_p3)
}
  0x43   :  { %67 = dma.hbm_to_vmem [thread:$0]  %s1829_s5, 1024, %s1668_s30, [#allocation9], %s1584_s13, %s1584_s13, %s1585_s14  }
  0x44   :  { %1574 = dma.done.wait [#allocation3], 128  }
  0x45   :  { %1575 = vsyncadd [#allocation3], 4294967168 }
  0x46   :  { %1576 = dma.done.wait [#allocation6], 7168  }
  0x47   :  { %1577 = vsyncadd [#allocation6], 4294960128 }
  0x48   :  { %1578 = dma.done.wait [#allocation9], 1024  }
  0x49   :  { %1579 = vsyncadd [#allocation9], 4294966272  ;;  %v1588_v0 = vmov 0.0   ;;  %vm1589_vm0 = vmmov 0   ;;  %v1383_v1 = vld [vmem:[#allocation5] sm:$0xff]   ;;  %v1384_v2 = vld [vmem:[#allocation5 + $0x8] sm:$0xff]  }
  0x4a   :  { %1214 = vmatprep.subr.bf16.mxu0 %v1588_v0  ;;  %1230 = vmatprep.mubr.msk.bf16.mxu0 %vm1589_vm0, %v1588_v0  ;;  %v1385_v3 = vld [vmem:[#allocation5 + $0x10] sm:$0xff]   ;;  %v1392_v4 = vld [vmem:[#allocation7] sm:$0xff]   ;;  %v1386_v5 = vld [vmem:[#allocation5 + $0x18] sm:$0xff]  }
  0x4b   :  { %1234 = vmatprep.subr.bf16.mxu1 %v1588_v0  ;;  %1250 = vmatprep.mubr.msk.bf16.mxu1 %vm1589_vm0, %v1588_v0  ;;  %v1393_v6 = vld [vmem:[#allocation7 + $0x8] sm:$0xff]   ;;  %v1387_v7 = vld [vmem:[#allocation5 + $0x20] sm:$0xff]   ;;  %v1394_v8 = vld [vmem:[#allocation7 + $0x10] sm:$0xff]  }
  0x4c   :  { %1215 = vmatpush3.bf16.msra.mxu0 %v1383_v1  ;;  %1235 = vmatpush3.bf16.msra.mxu1 %v1392_v4  ;;  %v1388_v9 = vld [vmem:[#allocation5 + $0x28] sm:$0xff]   ;;  %v1395_v10 = vld [vmem:[#allocation7 + $0x18] sm:$0xff]   ;;  %v1389_v11 = vld [vmem:[#allocation5 + $0x30] sm:$0xff]  }
  0x4d   :  { %1216 = vmatprep.subr.bf16.mxu0 %v1588_v0  ;;  %1236 = vmatprep.subr.bf16.mxu1 %v1588_v0  ;;  %v1390_v12 = vld [vmem:[#allocation5 + $0x38] sm:$0xff]   ;;  %v1396_v14 = vld [vmem:[#allocation7 + $0x20] sm:$0xff]   ;;  %v1397_v15 = vld [vmem:[#allocation7 + $0x28] sm:$0xff]  }
  0x4e   :  { %v1391_v13 = vld [vmem:[#allocation2] sm:$0xff]   ;;  %v1398_v16 = vld [vmem:[#allocation7 + $0x30] sm:$0xff]   ;;  %v1400_v18 = vld [vmem:[#allocation7 + $0x40] sm:$0xff]  }
  0x4f   :  { %v1399_v17 = vld [vmem:[#allocation7 + $0x38] sm:$0xff]   ;;  %v1401_v19 = vld [vmem:[#allocation7 + $0x48] sm:$0xff]   ;;  %v1402_v20 = vld [vmem:[#allocation7 + $0x50] sm:$0xff]  }
  0x50   :  { %1217 = vmatpush3.bf16.msra.mxu0 %v1384_v2  ;;  %1237 = vmatpush3.bf16.msra.mxu1 %v1393_v6  ;;  %v1403_v21 = vld [vmem:[#allocation7 + $0x58] sm:$0xff]   ;;  %v1404_v32 = vld [vmem:[#allocation7 + $0x60] sm:$0xff]   ;;  %v1405_v33 = vld [vmem:[#allocation7 + $0x68] sm:$0xff]  }
  0x51   :  { %1218 = vmatprep.subr.bf16.mxu0 %v1588_v0  ;;  %1238 = vmatprep.subr.bf16.mxu1 %v1588_v0  ;;  %v1055_v22 = vld [vmem:[%s1826_s2] ss:$0 sm:$0xff]  ;;  %v1406_v34 = vld [vmem:[#allocation7 + $0x70] sm:$0xff]   ;;  %v1408_v36 = vld [vmem:[#allocation7 + $0x80] sm:$0xff]  }
  0x52   :  { %v1407_v35 = vld [vmem:[#allocation7 + $0x78] sm:$0xff]   ;;  %v1409_v37 = vld [vmem:[#allocation7 + $0x88] sm:$0xff]   ;;  %v1410_v38 = vld [vmem:[#allocation7 + $0x90] sm:$0xff]  }
  0x53   :  { %v1411_v39 = vld [vmem:[#allocation7 + $0x98] sm:$0xff]   ;;  %v1412_v50 = vld [vmem:[#allocation7 + $0xa0] sm:$0xff]   ;;  %v1413_v51 = vld [vmem:[#allocation7 + $0xa8] sm:$0xff]  }
  0x54   :  { %1219 = vmatpush3.bf16.msra.mxu0 %v1385_v3  ;;  %1239 = vmatpush3.bf16.msra.mxu1 %v1394_v8  ;;  %v1065_v40 = vld [vmem:[%s1828_s4] ss:$0 sm:$0xff]  ;;  %v1414_v52 = vld [vmem:[#allocation7 + $0xb0] sm:$0xff]   ;;  %v1416_v54 = vld [vmem:[#allocation7 + $0xc0] sm:$0xff]  }
  0x55   :  { %1220 = vmatprep.subr.bf16.mxu0 %v1588_v0  ;;  %1240 = vmatprep.subr.bf16.mxu1 %v1588_v0  ;;  %v1415_v53 = vld [vmem:[#allocation7 + $0xb8] sm:$0xff]   ;;  %v1417_v55 = vld [vmem:[#allocation7 + $0xc8] sm:$0xff]   ;;  %v1418_v56 = vld [vmem:[#allocation7 + $0xd0] sm:$0xff]  }
  0x56   :  { %v1419_v57 = vld [vmem:[#allocation7 + $0xd8] sm:$0xff]   ;;  %v1420_v58 = vld [vmem:[#allocation7 + $0xe0] sm:$0xff]   ;;  %v1421_v59 = vld [vmem:[#allocation7 + $0xe8] sm:$0xff]  }
  0x57   :  { %v1075_v60 = vld [vmem:[%s1828_s4 + $0x1] ss:$0 sm:$0xff] }
  0x58   :  { %1221 = vmatpush3.bf16.msra.mxu0 %v1386_v5  ;;  %1241 = vmatpush3.bf16.msra.mxu1 %v1395_v10  ;;  %v1423_v8 = vld [vmem:[#allocation7 + $0xf8] sm:$0xff]   ;;  %v1425_v10 = vld [vmem:[#allocation7 + $0x108] sm:$0xff]  }
  0x59   :  { %1222 = vmatprep.subr.bf16.mxu0 %v1588_v0  ;;  %1242 = vmatprep.subr.bf16.mxu1 %v1588_v0 }
  0x5c   :  { %1223 = vmatpush3.bf16.msra.mxu0 %v1387_v7  ;;  %1243 = vmatpush3.bf16.msra.mxu1 %v1396_v14  ;;  %v1422_v7 = vld [vmem:[#allocation7 + $0xf0] sm:$0xff]   ;;  %v1429_v14 = vld [vmem:[#allocation7 + $0x128] sm:$0xff]  }
  0x5d   :  { %1224 = vmatprep.subr.bf16.mxu0 %v1588_v0  ;;  %1244 = vmatprep.subr.bf16.mxu1 %v1588_v0 }
  0x60   :  { %1225 = vmatpush3.bf16.msra.mxu0 %v1388_v9  ;;  %1245 = vmatpush3.bf16.msra.mxu1 %v1397_v15  ;;  %v1424_v9 = vld [vmem:[#allocation7 + $0x100] sm:$0xff]   ;;  %v1085_v15 = vld [vmem:[%s1828_s4 + $0x2] ss:$0 sm:$0xff] }
  0x61   :  { %1226 = vmatprep.subr.bf16.mxu0 %v1588_v0  ;;  %1246 = vmatprep.subr.bf16.mxu1 %v1588_v0 }
  0x64   :  { %1227 = vmatpush3.bf16.msra.mxu0 %v1389_v11  ;;  %1247 = vmatpush3.bf16.msra.mxu1 %v1398_v16  ;;  %v1426_v11 = vld [vmem:[#allocation7 + $0x110] sm:$0xff]  }
  0x65   :  { %1228 = vmatprep.subr.bf16.mxu0 %v1588_v0  ;;  %1248 = vmatprep.subr.bf16.mxu1 %v1588_v0 }
  0x68   :  { %1229 = vmatpush3.bf16.msra.mxu0 %v1390_v12  ;;  %1249 = vmatpush3.bf16.msra.mxu1 %v1399_v17  ;;  %v1427_v12 = vld [vmem:[#allocation7 + $0x118] sm:$0xff]  }
  0x69   :  { %1254 = vmatprep.subr.bf16.mxu0 %v1588_v0  ;;  %1274 = vmatprep.subr.bf16.mxu1 %v1588_v0 }
  0x6b   :  { %1231 = vmatmul.mubr.bf16.vlgmr.msra.gmra.mrb[0].mxu0 %v1391_v13  ;;  %v1428_v13 = vld [vmem:[#allocation7 + $0x120] sm:$0xff]  }
  0x6c   :  { %1270 = vmatprep.mubr.msk.bf16.mxu0 %vm1589_vm0, %v1588_v0  ;;  %1255 = vmatpush3.bf16.msra.mxu0 %v1400_v18 }
  0x6d   :  { %1256 = vmatprep.subr.bf16.mxu0 %v1588_v0 }
  0x70   :  { %1257 = vmatpush3.bf16.msra.mxu0 %v1401_v19 }
  0x71   :  { %1258 = vmatprep.subr.bf16.mxu0 %v1588_v0 }
  0x74   :  { %1259 = vmatpush3.bf16.msra.mxu0 %v1402_v20 }
  0x75   :  { %1260 = vmatprep.subr.bf16.mxu0 %v1588_v0 }
  0x78   :  { %1261 = vmatpush3.bf16.msra.mxu0 %v1403_v21 }
  0x79   :  { %1262 = vmatprep.subr.bf16.mxu0 %v1588_v0 }
  0x7c   :  { %1263 = vmatpush3.bf16.msra.mxu0 %v1404_v32  ;;  %v1437_v32 = vld [vmem:[#allocation7 + $0x168] sm:$0xff]  }
  0x7d   :  { %1264 = vmatprep.subr.bf16.mxu0 %v1588_v0 }
  0x80   :  { %1265 = vmatpush3.bf16.msra.mxu0 %v1405_v33  ;;  %v1095_v33 = vld [vmem:[%s1828_s4 + $0x3] ss:$0 sm:$0xff] }
  0x81   :  { %1266 = vmatprep.subr.bf16.mxu0 %v1588_v0 }
  0x84   :  { %1267 = vmatpush3.bf16.msra.mxu0 %v1406_v34 }
  0x85   :  { %1268 = vmatprep.subr.bf16.mxu0 %v1588_v0 }
  0x88   :  { %1269 = vmatpush3.bf16.msra.mxu0 %v1407_v35 }
  0x89   :  { %1294 = vmatprep.subr.bf16.mxu0 %v1588_v0 }
 0x13e   :  { %v196_v23 = vpop.f32.mrb[0].mxu0 }
 0x13f   :  { %v197_v24 = vadd.f32 %v1055_v22, %v196_v23  ;;  %v1232_v25 = vpop.f32.mrb[1].mxu0 }
 0x140   :  { %v199_v26 = vpop.f32.mrb[2].mxu0  ;;  %v1430_v25 = vld [vmem:[#allocation7 + $0x130] sm:$0xff]  }
 0x141   :  { %v200_v27 = vadd.f32 %v1055_v22, %v199_v26  ;;  %v1233_v28 = vpop.f32.mrb[3].mxu0  ;;  %1448 = vtanh.f32 %v197_v24  ;;  %v1431_v26 = vld [vmem:[#allocation7 + $0x138] sm:$0xff]  }
 0x142   :  { %v1433_v28 = vld [vmem:[#allocation7 + $0x148] sm:$0xff]  }
 0x143   :  { %1450 = vtanh.f32 %v200_v27  ;;  %v1432_v27 = vld [vmem:[#allocation7 + $0x140] sm:$0xff]  }
 0x14b   :  { %v1449_v29 = vpop.eup %1448 }
 0x14d   :  { %v1451_v30 = vpop.eup %1450 }
 0x14e   :  { %v222_v31 = vpack.c.bf16 %v1451_v30, %v1449_v29  ;;  %v1434_v29 = vld [vmem:[#allocation7 + $0x150] sm:$0xff]   ;;  %v1435_v30 = vld [vmem:[#allocation7 + $0x158] sm:$0xff]  }
 0x150   :  { %1251 = vmatmul.mubr.bf16.vlgmr.msra.gmra.mrb[0].mxu1 %v222_v31  ;;  %v1436_v31 = vld [vmem:[#allocation7 + $0x160] sm:$0xff]  }
 0x151   :  { %1290 = vmatprep.mubr.msk.bf16.mxu1 %vm1589_vm0, %v1588_v0  ;;  %1275 = vmatpush3.bf16.msra.mxu1 %v1408_v36 }
 0x152   :  { %1276 = vmatprep.subr.bf16.mxu1 %v1588_v0 }
 0x155   :  { %1277 = vmatpush3.bf16.msra.mxu1 %v1409_v37 }
 0x156   :  { %1278 = vmatprep.subr.bf16.mxu1 %v1588_v0 }
 0x159   :  { %1279 = vmatpush3.bf16.msra.mxu1 %v1410_v38 }
 0x15a   :  { %1280 = vmatprep.subr.bf16.mxu1 %v1588_v0 }
 0x15d   :  { %1281 = vmatpush3.bf16.msra.mxu1 %v1411_v39 }
 0x15e   :  { %1282 = vmatprep.subr.bf16.mxu1 %v1588_v0 }
 0x161   :  { %1283 = vmatpush3.bf16.msra.mxu1 %v1412_v50  ;;  %v1445_v50 = vld [vmem:[#allocation8 + $0x28] sm:$0xff]  }
 0x162   :  { %1284 = vmatprep.subr.bf16.mxu1 %v1588_v0 }
 0x165   :  { %1285 = vmatpush3.bf16.msra.mxu1 %v1413_v51  ;;  %v1105_v51 = vld [vmem:[%s1828_s4 + $0x4] ss:$0 sm:$0xff] }
 0x166   :  { %1286 = vmatprep.subr.bf16.mxu1 %v1588_v0 }
 0x169   :  { %1287 = vmatpush3.bf16.msra.mxu1 %v1414_v52 }
 0x16a   :  { %1288 = vmatprep.subr.bf16.mxu1 %v1588_v0 }
 0x16d   :  { %1289 = vmatpush3.bf16.msra.mxu1 %v1415_v53 }
 0x16e   :  { %1314 = vmatprep.subr.bf16.mxu1 %v1588_v0 }
 0x223   :  { %v311_v41 = vpop.f32.mrb[0].mxu1 }
 0x224   :  { %v312_v42 = vadd.f32 %v1065_v40, %v311_v41  ;;  %v1252_v43 = vpop.f32.mrb[1].mxu1 }
 0x225   :  { %v314_v44 = vpop.f32.mrb[2].mxu1  ;;  %v1438_v43 = vld [vmem:[#allocation7 + $0x170] sm:$0xff]  }
 0x226   :  { %v315_v45 = vadd.f32 %v1065_v40, %v314_v44  ;;  %v1253_v46 = vpop.f32.mrb[3].mxu1  ;;  %1452 = vtanh.f32 %v312_v42  ;;  %v1439_v44 = vld [vmem:[#allocation7 + $0x178] sm:$0xff]  }
 0x227   :  { %v1441_v46 = vld [vmem:[#allocation8 + $0x8] sm:$0xff]  }
 0x228   :  { %1454 = vtanh.f32 %v315_v45  ;;  %v1440_v45 = vld [vmem:[#allocation8] sm:$0xff]  }
 0x230   :  { %v1453_v47 = vpop.eup %1452 }
 0x232   :  { %v1455_v48 = vpop.eup %1454 }
 0x233   :  { %v339_v49 = vpack.c.bf16 %v1455_v48, %v1453_v47  ;;  %v1442_v47 = vld [vmem:[#allocation8 + $0x10] sm:$0xff]   ;;  %v1443_v48 = vld [vmem:[#allocation8 + $0x18] sm:$0xff]  }
 0x235   :  { %1271 = vmatmul.mubr.bf16.vlgmr.msra.gmra.mrb[4].mxu0 %v339_v49  ;;  %v1444_v49 = vld [vmem:[#allocation8 + $0x20] sm:$0xff]  }
 0x236   :  { %1310 = vmatprep.mubr.msk.bf16.mxu0 %vm1589_vm0, %v1588_v0  ;;  %1295 = vmatpush3.bf16.msra.mxu0 %v1416_v54 }
 0x237   :  { %1296 = vmatprep.subr.bf16.mxu0 %v1588_v0 }
 0x23a   :  { %1297 = vmatpush3.bf16.msra.mxu0 %v1417_v55 }
 0x23b   :  { %1298 = vmatprep.subr.bf16.mxu0 %v1588_v0 }
 0x23e   :  { %1299 = vmatpush3.bf16.msra.mxu0 %v1418_v56 }
 0x23f   :  { %1300 = vmatprep.subr.bf16.mxu0 %v1588_v0 }
 0x242   :  { %1301 = vmatpush3.bf16.msra.mxu0 %v1419_v57 }
 0x243   :  { %1302 = vmatprep.subr.bf16.mxu0 %v1588_v0 }
 0x246   :  { %1303 = vmatpush3.bf16.msra.mxu0 %v1420_v58 }
 0x247   :  { %1304 = vmatprep.subr.bf16.mxu0 %v1588_v0 }
 0x24a   :  { %1305 = vmatpush3.bf16.msra.mxu0 %v1421_v59 }
 0x24b   :  { %1306 = vmatprep.subr.bf16.mxu0 %v1588_v0 }
 0x24e   :  { %1307 = vmatpush3.bf16.msra.mxu0 %v1422_v7 }
 0x24f   :  { %1308 = vmatprep.subr.bf16.mxu0 %v1588_v0 }
 0x252   :  { %1309 = vmatpush3.bf16.msra.mxu0 %v1423_v8 }
 0x253   :  { %1334 = vmatprep.subr.bf16.mxu0 %v1588_v0 }
 0x308   :  { %v428_v61 = vpop.f32.mrb[4].mxu0 }
 0x309   :  { %v429_v62 = vadd.f32 %v1075_v60, %v428_v61  ;;  %v1272_v63 = vpop.f32.mrb[5].mxu0  ;;  %v1446_v61 = vld [vmem:[#allocation8 + $0x30] sm:$0xff]  }
 0x30a   :  { %v431_v1 = vpop.f32.mrb[6].mxu0  ;;  %v1115_v63 = vld [vmem:[%s1828_s4 + $0x5] ss:$0 sm:$0xff]  ;;  %s1590_s4 = smov [#allocation10]  }
 0x30b   :  { %v432_v2 = vadd.f32 %v1075_v60, %v431_v1  ;;  %v1273_v3 = vpop.f32.mrb[7].mxu0  ;;  %1456 = vtanh.f32 %v429_v62  ;;  %v1447_v62 = vld [vmem:[#allocation8 + $0x38] sm:$0xff]   ;;  %s1041_s18 = sshll.u32 %s1590_s4, 4  ;;  %s1042_s18 = int_to_ptr.vmem [resolvable:$true] %s1041_s18 }
 0x30c   :  { %p1557_p5 = scmp.lt.s32.totalorder %s1042_s18, %s1042_s18 }
 0x30d   :  { %1458 = vtanh.f32 %v432_v2 }
 0x315   :  { %v1457_v4 = vpop.eup %1456 }
 0x317   :  { %v1459_v5 = vpop.eup %1458 }
 0x318   :  { %v456_v6 = vpack.c.bf16 %v1459_v5, %v1457_v4 }
 0x31a   :  { %1291 = vmatmul.mubr.bf16.vlgmr.msra.gmra.mrb[4].mxu1 %v456_v6 }
 0x31b   :  { %1330 = vmatprep.mubr.msk.bf16.mxu1 %vm1589_vm0, %v1588_v0  ;;  %1315 = vmatpush3.bf16.msra.mxu1 %v1424_v9 }
 0x31c   :  { %1316 = vmatprep.subr.bf16.mxu1 %v1588_v0 }
 0x31f   :  { %1317 = vmatpush3.bf16.msra.mxu1 %v1425_v10 }
 0x320   :  { %1318 = vmatprep.subr.bf16.mxu1 %v1588_v0 }
 0x323   :  { %1319 = vmatpush3.bf16.msra.mxu1 %v1426_v11 }
 0x324   :  { %1320 = vmatprep.subr.bf16.mxu1 %v1588_v0 }
 0x327   :  { %1321 = vmatpush3.bf16.msra.mxu1 %v1427_v12 }
 0x328   :  { %1322 = vmatprep.subr.bf16.mxu1 %v1588_v0 }
 0x32b   :  { %1323 = vmatpush3.bf16.msra.mxu1 %v1428_v13 }
 0x32c   :  { %1324 = vmatprep.subr.bf16.mxu1 %v1588_v0 }
 0x32f   :  { %1325 = vmatpush3.bf16.msra.mxu1 %v1429_v14 }
 0x330   :  { %1326 = vmatprep.subr.bf16.mxu1 %v1588_v0 }
 0x333   :  { %1327 = vmatpush3.bf16.msra.mxu1 %v1430_v25 }
 0x334   :  { %1328 = vmatprep.subr.bf16.mxu1 %v1588_v0 }
 0x337   :  { %1329 = vmatpush3.bf16.msra.mxu1 %v1431_v26 }
 0x338   :  { %1354 = vmatprep.subr.bf16.mxu1 %v1588_v0 }
 0x3ed   :  { %v545_v16 = vpop.f32.mrb[4].mxu1 }
 0x3ee   :  { %v546_v17 = vadd.f32 %v1085_v15, %v545_v16  ;;  %v1292_v18 = vpop.f32.mrb[5].mxu1 }
 0x3ef   :  { %v548_v19 = vpop.f32.mrb[6].mxu1 }
 0x3f0   :  { %v549_v20 = vadd.f32 %v1085_v15, %v548_v19  ;;  %v1293_v21 = vpop.f32.mrb[7].mxu1  ;;  %v552_v22 = vmax.f32 %v546_v17, 0.0 }
 0x3f2   :  { %v553_v23 = vmax.f32 %v549_v20, 0.0 }
 0x3f4   :  { %v573_v24 = vpack.c.bf16 %v553_v23, %v552_v22 }
 0x3f6   :  { %1311 = vmatmul.mubr.bf16.vlgmr.msra.gmra.mrb[8].mxu0 %v573_v24 }
 0x3f7   :  { %1350 = vmatprep.mubr.msk.bf16.mxu0 %vm1589_vm0, %v1588_v0  ;;  %1335 = vmatpush3.bf16.msra.mxu0 %v1432_v27 }
 0x3f8   :  { %1336 = vmatprep.subr.bf16.mxu0 %v1588_v0 }
 0x3fb   :  { %1337 = vmatpush3.bf16.msra.mxu0 %v1433_v28 }
 0x3fc   :  { %1338 = vmatprep.subr.bf16.mxu0 %v1588_v0 }
 0x3ff   :  { %1339 = vmatpush3.bf16.msra.mxu0 %v1434_v29 }
 0x400   :  { %1340 = vmatprep.subr.bf16.mxu0 %v1588_v0 }
 0x403   :  { %1341 = vmatpush3.bf16.msra.mxu0 %v1435_v30 }
 0x404   :  { %1342 = vmatprep.subr.bf16.mxu0 %v1588_v0 }
 0x407   :  { %1343 = vmatpush3.bf16.msra.mxu0 %v1436_v31 }
 0x408   :  { %1344 = vmatprep.subr.bf16.mxu0 %v1588_v0 }
 0x40b   :  { %1345 = vmatpush3.bf16.msra.mxu0 %v1437_v32 }
 0x40c   :  { %1346 = vmatprep.subr.bf16.mxu0 %v1588_v0 }
 0x40f   :  { %1347 = vmatpush3.bf16.msra.mxu0 %v1438_v43 }
 0x410   :  { %1348 = vmatprep.subr.bf16.mxu0 %v1588_v0 }
 0x413   :  { %1349 = vmatpush3.bf16.msra.mxu0 %v1439_v44 }
 0x4c9   :  { %v662_v34 = vpop.f32.mrb[8].mxu0 }
 0x4ca   :  { %v663_v35 = vadd.f32 %v1095_v33, %v662_v34  ;;  %v1312_v36 = vpop.f32.mrb[9].mxu0 }
 0x4cb   :  { %v665_v37 = vpop.f32.mrb[10].mxu0 }
 0x4cc   :  { %v666_v38 = vadd.f32 %v1095_v33, %v665_v37  ;;  %v1313_v39 = vpop.f32.mrb[11].mxu0  ;;  %v669_v40 = vmax.f32 %v663_v35, 0.0 }
 0x4ce   :  { %v670_v41 = vmax.f32 %v666_v38, 0.0 }
 0x4d0   :  { %v690_v42 = vpack.c.bf16 %v670_v41, %v669_v40 }
 0x4d2   :  { %1331 = vmatmul.mubr.bf16.vlgmr.msra.gmra.mrb[8].mxu1 %v690_v42 }
 0x4d3   :  { %1370 = vmatprep.mubr.msk.bf16.mxu1 %vm1589_vm0, %v1588_v0  ;;  %1355 = vmatpush3.bf16.msra.mxu1 %v1440_v45 }
 0x4d4   :  { %1356 = vmatprep.subr.bf16.mxu1 %v1588_v0 }
 0x4d7   :  { %1357 = vmatpush3.bf16.msra.mxu1 %v1441_v46 }
 0x4d8   :  { %1358 = vmatprep.subr.bf16.mxu1 %v1588_v0 }
 0x4db   :  { %1359 = vmatpush3.bf16.msra.mxu1 %v1442_v47 }
 0x4dc   :  { %1360 = vmatprep.subr.bf16.mxu1 %v1588_v0 }
 0x4df   :  { %1361 = vmatpush3.bf16.msra.mxu1 %v1443_v48 }
 0x4e0   :  { %1362 = vmatprep.subr.bf16.mxu1 %v1588_v0 }
 0x4e3   :  { %1363 = vmatpush3.bf16.msra.mxu1 %v1444_v49 }
 0x4e4   :  { %1364 = vmatprep.subr.bf16.mxu1 %v1588_v0 }
 0x4e7   :  { %1365 = vmatpush3.bf16.msra.mxu1 %v1445_v50 }
 0x4e8   :  { %1366 = vmatprep.subr.bf16.mxu1 %v1588_v0 }
 0x4eb   :  { %1367 = vmatpush3.bf16.msra.mxu1 %v1446_v61 }
 0x4ec   :  { %1368 = vmatprep.subr.bf16.mxu1 %v1588_v0  ;;  %v1124_v0 = vld [vmem:[%s1830_s6] ss:$0 sm:$0xff]  ;;  %s1552_s6 = scalar_lea.vmem %s1042_s18, 128 }
 0x4ed   :  { %p1553_p4 = scmp.ne.s32.totalorder %s1042_s18, %s1552_s6  ;;  %p1558_p6 = scmp.lt.s32.totalorder %s1552_s6, %s1552_s6 }
 0x4ef   :  { %1369 = vmatpush3.bf16.msra.mxu1 %v1447_v62  ;;  %p1559_p7 = por %p1558_p6, %p1557_p5 }
 0x4f1   :  { %p1560_p8 = pnand %p1559_p7, %p1553_p4 }
 0x5a5   :  { %v779_v52 = vpop.f32.mrb[8].mxu1 }
 0x5a6   :  { %v780_v53 = vadd.f32 %v1105_v51, %v779_v52  ;;  %v1332_v54 = vpop.f32.mrb[9].mxu1 }
 0x5a7   :  { %v782_v55 = vpop.f32.mrb[10].mxu1 }
 0x5a8   :  { %v783_v56 = vadd.f32 %v1105_v51, %v782_v55  ;;  %v1333_v57 = vpop.f32.mrb[11].mxu1  ;;  %v786_v58 = vmax.f32 %v780_v53, 0.0 }
 0x5aa   :  { %v787_v59 = vmax.f32 %v783_v56, 0.0 }
 0x5ac   :  { %v807_v60 = vpack.c.bf16 %v787_v59, %v786_v58 }
 0x5ae   :  { %1351 = vmatmul.mubr.bf16.vlgmr.msra.gmra.mrb[12].mxu0 %v807_v60 }
 0x681   :  { %v896_v1 = vpop.f32.mrb[12].mxu0 }
 0x682   :  { %v897_v2 = vadd.f32 %v1115_v63, %v896_v1  ;;  %v1352_v3 = vpop.f32.mrb[13].mxu0 }
 0x683   :  { %v899_v4 = vpop.f32.mrb[14].mxu0 }
 0x684   :  { %v900_v5 = vadd.f32 %v1115_v63, %v899_v4  ;;  %v1353_v6 = vpop.f32.mrb[15].mxu0  ;;  %v903_v7 = vmax.f32 %v897_v2, 0.0 }
 0x686   :  { %v904_v8 = vmax.f32 %v900_v5, 0.0 }
 0x688   :  { %v922_v9 = vpack.c.bf16 %v904_v8, %v903_v7 }
 0x68a   :  { %1371 = vmatmul.mubr.bf16.vlgmr.msra.gmra.mrb[12].mxu1 %v922_v9 }
 0x75d   :  { %v1011_v10 = vpop.f32.mrb[12].mxu1 }
 0x75e   :  { %v1012_v11 = vadd.f32 %v1124_v0, %v1011_v10  ;;  %v1372_v12 = vpop.f32.mrb[13].mxu1 }
 0x75f   :  { %v1014_v13 = vpop.f32.mrb[14].mxu1 }
 0x760   :  { %v1018_v14 = vmul.f32 0.5, %v1012_v11  ;;  %v1015_v15 = vadd.f32 %v1124_v0, %v1014_v13  ;;  %v1373_v16 = vpop.f32.mrb[15].mxu1 }
 0x762   :  { %1460 = vtanh.f32 %v1018_v14  ;;  %v1019_v17 = vmul.f32 0.5, %v1015_v15 }
 0x764   :  { %1462 = vtanh.f32 %v1019_v17 }
 0x76c   :  { %v1461_v18 = vpop.eup %1460 }
 0x76d   :  { %v1022_v19 = vadd.f32 1.0, %v1461_v18 }
 0x76e   :  { %v1463_v20 = vpop.eup %1462 }
 0x76f   :  { %v1023_v21 = vadd.f32 1.0, %v1463_v20  ;;  %v1024_v22 = vmul.f32 0.5, %v1022_v19 }
 0x771   :  { %v1025_v23 = vmul.f32 0.5, %v1023_v21 }
 0x773   :  { %v1140_v24 = vpack.c.bf16 %v1025_v23, %v1024_v22 }
 0x775   :  { %1141 = vst [vmem:[#allocation10] sm:$0xff] %v1140_v24  }
 0x776   :  { %1563 = shalt.err (!%p1560_p8)
}
 0x777   :  { %s1564_s21 = scalar_lea.hbm %s1831_s7, 128 }
 0x778   :  { %p1565_p9 = scmp.ne.s32.totalorder %s1831_s7, %s1564_s21  ;;  %p1568_p10 = scmp.lt.u32.totalorder %s1564_s21, %s1831_s7 }
 0x77a   :  { %p1570_p11 = pnand %p1568_p10, %p1565_p9 }
 0x77c   :  { %1573 = shalt.err (!%p1570_p11)
}
 0x77d   :  { %1047 = dma.vmem_to_hbm [thread:$0]  %s1042_s18, 128, %s1831_s7, [#allocation4], %s1584_s13, %s1584_s13, %s1585_s14  }
 0x77e   :  { %1580 = dma.done.wait [#allocation4], 128  }
 0x77f   :  { %1581 = vsyncadd [#allocation4], 4294967168 }
 0x780   :  { %1051 = vsyncpa [#allocation3], 1 }
 0x781   :  { %1052 = vsyncpa [#allocation6], 1 }
 0x782   :  { %1053 = vsyncpa [#allocation9], 1 }
 0x783   :  { %1054 = vsyncpa [#allocation4], 1 }

</bundles_post_ra>
